<compile_context>
chip_gen: v7x
topology: tpu7x:2x2x1
jax: 0.10.0
libtpu: 0.0.40
codegen_flags: <defaults>
</compile_context>

<pallas_src>
import functools

import jax
import jax.numpy as jnp
import numpy as np
from jax import lax
from jax.experimental import pallas as pl
from jax.experimental.pallas import tpu as pltpu


def _round_up(x, m):
    return ((x + m - 1) // m) * m


def fm_kernel(idx_ref, tbl_ref, out_ref, *, num_fields, emb_dim, chunk):
    """One batch tile of the FM forward.

    idx_ref : (F, TB)        int32  global (offset-added) indices, batch on lanes
    tbl_ref : (R_pad, V_pad) f32    rows 0..D-1 = E^T, row D = (w - 0.5*rowsum(E*E))^T
    out_ref : (1, TB)        f32    FM output (lane-dense)
    """
    V_pad = tbl_ref.shape[1]
    TB = idx_ref.shape[1]
    num_chunks = TB // chunk

    tbl = tbl_ref[...]                                              # tiny, resident
    iota_v = lax.broadcasted_iota(jnp.int32, (V_pad, chunk), 0)     # loop-invariant

    def body(c, carry):
        start = pl.multiple_of(c * chunk, chunk)
        idx_c = idx_ref[:, pl.ds(start, chunk)]                     # (F, chunk)

        # Multi-hot over the (small, static) field axis; integer accumulate,
        # single cast to f32 before the matmul.  Repeated indices count with
        # multiplicity (exact).
        mh = (iota_v == idx_c[0:1, :]).astype(jnp.int32)
        for f in range(1, num_fields):
            mh = mh + (iota_v == idx_c[f:f + 1, :]).astype(jnp.int32)

        # Fused MXU matmul per chunk: (R_pad, V_pad) @ (V_pad, chunk).
        res = jnp.dot(tbl, mh.astype(jnp.float32),
                      preferred_element_type=jnp.float32)
        sum_emb = res[0:emb_dim, :]                                 # sum_f e
        lin = res[emb_dim:emb_dim + 1, :]                           # first - 0.5*sum_of_square
        second = 0.5 * jnp.sum(sum_emb * sum_emb, axis=0, keepdims=True)
        out_ref[:, pl.ds(start, chunk)] = lin + second
        return carry

    lax.fori_loop(0, num_chunks, body, 0, unroll=True)


def build_fm_combined_table(first_order_weights, embedding_table):
    """Fused FM table, precomputed ONCE per weight update.

    Returns (round_up(D+1,8), round_up(V,8)) f32 with
      rows 0..D-1 : E^T
      row  D      : (w - 0.5 * rowsum(E*E))^T
    and zero padding elsewhere (alignment only; contributes nothing).
    """
    V, D = embedding_table.shape
    e = embedding_table.astype(jnp.float32)
    w = first_order_weights.astype(jnp.float32)                     # (V, 1)
    lin_row = (w[:, 0] - 0.5 * jnp.sum(e * e, axis=1))[None, :]     # (1, V)
    combined = jnp.concatenate([e.T, lin_row], axis=0)              # (D+1, V)
    r_pad = _round_up(D + 1, 8)
    v_pad = _round_up(V, 8)
    padded = jnp.zeros((r_pad, v_pad), jnp.float32)
    return padded.at[:D + 1, :V].set(combined)


def fm_layer_forward(x, offsets, combined_table, emb_dim, *, block_batch=2048):
    """x: (B, F) int32 raw per-field indices; returns (B, 1) f32."""
    B, F = x.shape
    R_pad, V_pad = combined_table.shape

    # ---- tile selection --------------------------------------------------
    # Fat tiles (amortize per-grid-step overhead) but >= 2 grid steps whenever
    # the batch allows, so v7x's 2 TensorCores both get work.
    half = -(-B // 2)
    TB = _round_up(max(128, min(block_batch, half)), 128)
    B_pad = _round_up(B, TB)
    # Lane chunk for the in-kernel multi-hot build (bounds the live vreg set
    # regardless of TB); must divide TB (TB is always a multiple of 128).
    chunk = 256 if TB % 256 == 0 else 128

    # ---- layout plumbing (wrapper, not kernel) -----------------------------
    idx = (x + offsets).astype(jnp.int32)                           # (B, F) global indices
    # Padding columns use index 0 (valid since offsets[0] == 0); sliced off below.
    idx_t = jnp.zeros((F, B_pad), jnp.int32)
    idx_t = idx_t.at[:, :B].set(idx.T)

    grid = (B_pad // TB,)
    kern = functools.partial(fm_kernel, num_fields=F, emb_dim=emb_dim, chunk=chunk)

    out = pl.pallas_call(
        kern,
        out_shape=jax.ShapeDtypeStruct((1, B_pad), jnp.float32),
        grid=grid,
        in_specs=[
            pl.BlockSpec((F, TB), lambda i: (0, i)),                # per-tile indices
            pl.BlockSpec((R_pad, V_pad), lambda i: (0, 0)),         # resident fused table
        ],
        out_specs=pl.BlockSpec((1, TB), lambda i: (0, i)),          # lane-dense output slab
        compiler_params=pltpu.CompilerParams(
            dimension_semantics=("parallel",),
            vmem_limit_bytes=4 * 1024 * 1024,
        ),
    )(idx_t, combined_table)

    return out[0, :B].reshape(B, 1)


def fm_layer_reference(x, offsets, first_order_weights, embedding_table):
    # Pure-JAX reference mirroring the PyTorch forward.
    idx = x + offsets                                               # (B, F)
    first = jnp.sum(first_order_weights[:, 0][idx], axis=1, keepdims=True)
    emb_x = embedding_table[idx]                                    # (B, F, D)
    square_of_sum = jnp.sum(emb_x, axis=1) ** 2
    sum_of_square = jnp.sum(emb_x ** 2, axis=1)
    second = 0.5 * jnp.sum(square_of_sum - sum_of_square, axis=1, keepdims=True)
    return first + second


if __name__ == "__main__":
    # Module config (small, consistent with FMLayer(field_dims, embedding_dim)).
    field_dims = [10, 8, 6, 4]
    embedding_dim = 16
    vocab = sum(field_dims)
    num_fields = len(field_dims)

    key = jax.random.PRNGKey(0)
    k_w, k_e, k_x = jax.random.split(key, 3)

    # Deterministic xavier_normal_-style init.
    std_w = float(np.sqrt(2.0 / (vocab + 1)))
    first_order_weights = std_w * jax.random.normal(
        k_w, (vocab, 1), dtype=jnp.float32
    )
    std_e = float(np.sqrt(2.0 / (vocab + embedding_dim)))
    embedding_table = std_e * jax.random.normal(
        k_e, (vocab, embedding_dim), dtype=jnp.float32
    )

    # Offsets: (0, cumsum(field_dims)[:-1]) — (1, num_fields) for broadcast.
    offsets = jnp.asarray(
        np.array((0, *np.cumsum(field_dims)[:-1]), dtype=np.int32)
    ).reshape(1, num_fields)

    # Fused table precomputed ONCE per weight update (hoisted out of forward).
    combined = jax.block_until_ready(
        build_fm_combined_table(first_order_weights, embedding_table)
    )

    def make_x(batch):
        cols = []
        for f, dim in enumerate(field_dims):
            kf = jax.random.fold_in(k_x, f * 1000 + batch)
            cols.append(jax.random.randint(kf, (batch, 1), 0, dim, dtype=jnp.int32))
        return jnp.concatenate(cols, axis=1)                       # (batch, F) int32

    # batch=8    -> single grid step, single chunk.
    # batch=300  -> 2 parallel grid steps (megacore split), padded batch.
    # batch=2000 -> 2 parallel grid steps, TB=1024 with 4 in-kernel lane chunks.
    for batch in (8, 300, 2000):
        xb = make_x(batch)
        out = jax.block_until_ready(
            fm_layer_forward(xb, offsets, combined, embedding_dim)
        )
        ref = fm_layer_reference(xb, offsets, first_order_weights, embedding_table)
        np.testing.assert_allclose(np.asarray(out), np.asarray(ref),
                                   rtol=1e-5, atol=1e-5)

    print("KERNEL_OK")
</pallas_src>

<mosaic_0001>
module attributes {stable_mosaic.version = 11 : i64} {
  func.func @fm_kernel(%arg0: i32, %arg1: memref<4x128xi32, #tpu.memory_space<vmem>>, %arg2: memref<24x32xf32, #tpu.memory_space<vmem>>, %arg3: memref<1x128xf32, #tpu.memory_space<vmem>>) attributes {dimension_semantics = [#tpu.dimension_semantics<parallel>], iteration_bounds = array<i64: 1>, scalar_prefetch = 0 : i64, scratch_operands = 0 : i64, tpu.core_type = #tpu.core_type<tc>, window_params = [{transform_indices = @transform_0, window_bounds = array<i64: 4, 128>}, {pipeline_mode = #tpu.pipeline_mode<synchronous>, transform_indices = @transform_1, window_bounds = array<i64: 24, 32>}, {transform_indices = @transform_2, window_bounds = array<i64: 1, 128>}]} {
    %c0 = arith.constant 0 : index
    %c0_0 = arith.constant 0 : index
    %0 = vector.load %arg2[%c0, %c0_0] : memref<24x32xf32, #tpu.memory_space<vmem>>, vector<24x32xf32>
    %1 = tpu.iota {dimensions = array<i32: 0>} : vector<32x128xi32>
    %c0_i32 = arith.constant 0 : i32
    %c128_i32 = arith.constant 128 : i32
    %2 = arith.muli %c0_i32, %c128_i32 : i32
    %3 = tpu.assume_multiple %2, 128 : i32
    %c0_1 = arith.constant 0 : index
    %4 = arith.index_cast %3 : i32 to index
    %5 = vector.load %arg1[%c0_1, %4] : memref<4x128xi32, #tpu.memory_space<vmem>>, vector<4x128xi32>
    %6 = vector.extract_strided_slice %5 {offsets = [0, 0], sizes = [1, 128], strides = [1, 1]} : vector<4x128xi32> to vector<1x128xi32>
    %7 = vector.broadcast %6 : vector<1x128xi32> to vector<32x128xi32>
    %8 = arith.cmpi eq, %1, %7 : vector<32x128xi32>
    %9 = arith.extui %8 : vector<32x128xi1> to vector<32x128xi32>
    %10 = vector.extract_strided_slice %5 {offsets = [1, 0], sizes = [1, 128], strides = [1, 1]} : vector<4x128xi32> to vector<1x128xi32>
    %11 = vector.broadcast %10 : vector<1x128xi32> to vector<32x128xi32>
    %12 = arith.cmpi eq, %1, %11 : vector<32x128xi32>
    %13 = arith.extui %12 : vector<32x128xi1> to vector<32x128xi32>
    %14 = arith.addi %9, %13 : vector<32x128xi32>
    %15 = vector.extract_strided_slice %5 {offsets = [2, 0], sizes = [1, 128], strides = [1, 1]} : vector<4x128xi32> to vector<1x128xi32>
    %16 = vector.broadcast %15 : vector<1x128xi32> to vector<32x128xi32>
    %17 = arith.cmpi eq, %1, %16 : vector<32x128xi32>
    %18 = arith.extui %17 : vector<32x128xi1> to vector<32x128xi32>
    %19 = arith.addi %14, %18 : vector<32x128xi32>
    %20 = vector.extract_strided_slice %5 {offsets = [3, 0], sizes = [1, 128], strides = [1, 1]} : vector<4x128xi32> to vector<1x128xi32>
    %21 = vector.broadcast %20 : vector<1x128xi32> to vector<32x128xi32>
    %22 = arith.cmpi eq, %1, %21 : vector<32x128xi32>
    %23 = arith.extui %22 : vector<32x128xi1> to vector<32x128xi32>
    %24 = arith.addi %19, %23 : vector<32x128xi32>
    %25 = arith.sitofp %24 : vector<32x128xi32> to vector<32x128xf32>
    %cst = arith.constant dense<0.000000e+00> : vector<24x128xf32>
    %26 = tpu.matmul %0, %25, %cst {dimension_numbers = #tpu.dot_dimension_numbers<[1], [0], [0], [1], [0, 0, 1, 1], [], []>} : vector<24x32xf32>, vector<32x128xf32>, vector<24x128xf32> -> vector<24x128xf32>
    %27 = vector.extract_strided_slice %26 {offsets = [0, 0], sizes = [16, 128], strides = [1, 1]} : vector<24x128xf32> to vector<16x128xf32>
    %28 = vector.extract_strided_slice %26 {offsets = [16, 0], sizes = [1, 128], strides = [1, 1]} : vector<24x128xf32> to vector<1x128xf32>
    %29 = arith.mulf %27, %27 : vector<16x128xf32>
    %cst_2 = arith.constant dense<0.000000e+00> : vector<128xf32>
    %30 = vector.multi_reduction <add>, %29, %cst_2 [0] : vector<16x128xf32> to vector<128xf32>
    %31 = vector.shape_cast %30 : vector<128xf32> to vector<1x128xf32>
    %cst_3 = arith.constant 5.000000e-01 : f32
    %32 = vector.broadcast %cst_3 : f32 to vector<1x128xf32>
    %33 = arith.mulf %32, %31 : vector<1x128xf32>
    %34 = arith.addf %28, %33 : vector<1x128xf32>
    %c0_4 = arith.constant 0 : index
    %35 = arith.index_cast %3 : i32 to index
    %36 = vector.load %arg3[%c0_4, %35] : memref<1x128xf32, #tpu.memory_space<vmem>>, vector<1x128xf32>
    tpu.vector_store %arg3[%c0_4, %35], %34 {strides = array<i32>} : memref<1x128xf32, #tpu.memory_space<vmem>>, vector<1x128xf32>,
    %c1_i32 = arith.constant 1 : i32
    return
  }
  func.func @transform_0(%arg0: i32) -> (i32, i32) {
    %c0_i32 = arith.constant 0 : i32
    %c0_i32_0 = arith.constant 0 : i32
    return %c0_i32, %arg0 : i32, i32
  }
  func.func @transform_1(%arg0: i32) -> (i32, i32) {
    %c0_i32 = arith.constant 0 : i32
    %c0_i32_0 = arith.constant 0 : i32
    %c0_i32_1 = arith.constant 0 : i32
    return %c0_i32, %c0_i32_0 : i32, i32
  }
  func.func @transform_2(%arg0: i32) -> (i32, i32) {
    %c0_i32 = arith.constant 0 : i32
    %c0_i32_0 = arith.constant 0 : i32
    return %c0_i32, %arg0 : i32, i32
  }
}

</mosaic_0001>

<bundles_post_ra>
// kernel: tpu_custom_call.1
= control target key start
LH: loop header
LB: loop body
LE: loop exit
PB: predicated region body
PF: predicated region fallthrough
CT: control target
= control target key end

     0   :  { %7 = vsyncpa [#allocation3], 0  ;;  %s424_s0 = inlined_call_operand.hbm [shape: s32[4,128], index: 0, kind: input, shape index: {}]   ;;  %s425_s1 = inlined_call_operand.hbm [shape: f32[24,32], index: 1, kind: input, shape index: {}]   ;;  %s426_s2 = inlined_call_operand.hbm [shape: f32[1,128], index: 2, kind: output, shape index: {}]  }
   0x1   :  { %8 = vsyncpa [#allocation6], 0 }
   0x2   :  { %9 = vsyncpa [#allocation4], 0  ;;  %s347_s9 = smov [#allocation2]   ;;  %s348_s11 = smov [#allocation5]  }
   0x3   :  { %s16_s10 = sshll.u32 %s347_s9, 4  ;;  %s25_s12 = sshll.u32 %s348_s11, 4  ;;  %s17_s10 = int_to_ptr.vmem [resolvable:$true] %s16_s10  ;;  %s371_s12 = int_to_ptr.vmem [resolvable:$true] %s25_s12 }
   0x4   :  { %s275_s15 = scalar_lea.hbm %s424_s0, 64 }
   0x5   :  { %p276_p0 = scmp.ne.s32.totalorder %s424_s0, %s275_s15  ;;  %p279_p1 = scmp.lt.u32.totalorder %s275_s15, %s424_s0 }
   0x7   :  { %p281_p2 = pnand %p279_p1, %p276_p0 }
   0x9   :  { %284 = shalt.err (!%p281_p2)
}
   0xa   :  { %s285_s20 = scalar_lea.vmem %s17_s10, 64  ;;  %p290_p4 = scmp.lt.s32.totalorder %s17_s10, %s17_s10 }
   0xb   :  { %p286_p3 = scmp.ne.s32.totalorder %s17_s10, %s285_s20  ;;  %p291_p5 = scmp.lt.s32.totalorder %s285_s20, %s285_s20 }
   0xd   :  { %p292_p6 = por %p291_p5, %p290_p4 }
   0xf   :  { %p293_p7 = pnand %p292_p6, %p286_p3 }
  0x11   :  { %296 = shalt.err (!%p293_p7)
}
  0x12   :  { %19 = dma.hbm_to_vmem [thread:$0]  %s424_s0, 64, %s17_s10, [#allocation3]  }
  0x13   :  { %s297_s25 = scalar_lea.hbm %s425_s1, 384 }
  0x14   :  { %p298_p8 = scmp.ne.s32.totalorder %s425_s1, %s297_s25  ;;  %p301_p9 = scmp.lt.u32.totalorder %s297_s25, %s425_s1 }
  0x16   :  { %p303_p10 = pnand %p301_p9, %p298_p8 }
  0x18   :  { %306 = shalt.err (!%p303_p10)
}
  0x19   :  { %s307_s30 = scalar_lea.vmem %s371_s12, 384  ;;  %p312_p12 = scmp.lt.s32.totalorder %s371_s12, %s371_s12 }
  0x1a   :  { %p308_p11 = scmp.ne.s32.totalorder %s371_s12, %s307_s30  ;;  %p313_p13 = scmp.lt.s32.totalorder %s307_s30, %s307_s30 }
  0x1c   :  { %p314_p0 = por %p313_p13, %p312_p12 }
  0x1e   :  { %p315_p1 = pnand %p314_p0, %p308_p11 }
  0x20   :  { %318 = shalt.err (!%p315_p1)
}
  0x21   :  { %s349_s0 = smov 128   ;;  %s350_s3 = smov 8  }
  0x22   :  { %31 = dma.hbm_to_vmem [thread:$0]  %s425_s1, 384, %s371_s12, [#allocation6], %s349_s0, %s349_s0, %s350_s3  }
  0x23   :  { %341 = dma.done.wait [#allocation3], 64  }
  0x24   :  { %342 = vsyncadd [#allocation3], 4294967232 }
  0x25   :  { %343 = dma.done.wait [#allocation6], 384  }
  0x26   :  { %344 = vsyncadd [#allocation6], 4294966912  ;;  %v41_v0 = vlaneseq  ;;  %v351_v1 = vmov 0.0|0.0   ;;  %vm352_vm0 = vmmov 0   ;;  %v353_v3 = vmov 0.0   ;;  %v38_v51 = vld [vmem:[#allocation5] sm:$0xff] }
  0x27   :  { %256 = vmatprep.subr.bf16.mxu0 %v351_v1  ;;  %262 = vmatprep.subr.bf16.mxu1 %v351_v1  ;;  %v46_v9 = vld [vmem:[#allocation2] sm:$0xf]  ;;  %v354_v16 = vmov 0   ;;  %v39_v52 = vld [vmem:[#allocation5 + $0x8] sm:$0xff]  ;;  %v40_v53 = vld [vmem:[#allocation5 + $0x10] sm:$0xff]  ;;  %s355_s1 = smov [#allocation7]  }
  0x28   :  { %v42_v2 = vshrl.u32 %v41_v0, 7  ;;  %247 = vmatprep.mubr.msk.f32.mxu0 %vm352_vm0, %v353_v3  ;;  %250 = vmatprep.mubr.msk.f32.mxu1 %vm352_vm0, %v353_v3  ;;  %s219_s6 = sshll.u32 %s355_s1, 4  ;;  %s220_s6 = int_to_ptr.vmem [resolvable:$true] %s219_s6 }
  0x29   :  { %s319_s7 = scalar_lea.vmem %s220_s6, 16  ;;  %s323_s8 = scalar_lea.vmem %s220_s6, 32 }
  0x2a   :  { %v49_v4 = vsub.s32 0, %v42_v2  ;;  %v61_v5 = vsub.s32 1, %v42_v2  ;;  %v77_v6 = vsub.s32 2, %v42_v2  ;;  %v93_v7 = vsub.s32 3, %v42_v2  ;;  %p320_p2 = scmp.ne.s32.totalorder %s220_s6, %s319_s7  ;;  %p324_p3 = scmp.lt.s32.totalorder %s220_s6, %s220_s6 }
  0x2b   :  { %v43_v8 = vadd.s32 8, %v42_v2  ;;  %v44_v14 = vadd.s32 16, %v42_v2  ;;  %v45_v15 = vadd.s32 24, %v42_v2  ;;  %p325_p4 = scmp.lt.s32.totalorder %s323_s8, %s319_s7 }
  0x2c   :  { %v50_v10 = vrot.slane %v46_v9, %v49_v4  ;;  %v62_v11 = vrot.slane %v46_v9, %v61_v5  ;;  %v78_v12 = vrot.slane %v46_v9, %v77_v6  ;;  %v94_v13 = vrot.slane %v46_v9, %v93_v7 }
  0x2d   :  { %p326_p5 = por %p325_p4, %p324_p3 }
  0x2e   :  { %vm51_vm1 = vcmp.eq.s32.totalorder %v42_v2, %v50_v10  ;;  %vm52_vm2 = vcmp.eq.s32.totalorder %v43_v8, %v50_v10  ;;  %vm63_vm3 = vcmp.eq.s32.totalorder %v42_v2, %v62_v11  ;;  %vm64_vm4 = vcmp.eq.s32.totalorder %v43_v8, %v62_v11 }
  0x2f   :  { %v55_v17 = vsel %vm51_vm1, 1, %v354_v16  ;;  %v56_v18 = vsel %vm52_vm2, 1, %v354_v16  ;;  %v67_v19 = vsel %vm63_vm3, 1, %v354_v16  ;;  %v68_v20 = vsel %vm64_vm4, 1, %v354_v16  ;;  %p327_p6 = pnand %p326_p5, %p320_p2 }
  0x30   :  { %v71_v21 = vadd.s32 %v67_v19, %v55_v17  ;;  %v72_v22 = vadd.s32 %v68_v20, %v56_v18  ;;  %vm79_vm5 = vcmp.eq.s32.totalorder %v42_v2, %v78_v12  ;;  %vm80_vm6 = vcmp.eq.s32.totalorder %v43_v8, %v78_v12 }
  0x31   :  { %v83_v23 = vsel %vm79_vm5, 1, %v354_v16  ;;  %v84_v24 = vsel %vm80_vm6, 1, %v354_v16  ;;  %vm95_vm7 = vcmp.eq.s32.totalorder %v42_v2, %v94_v13  ;;  %vm96_vm8 = vcmp.eq.s32.totalorder %v43_v8, %v94_v13 }
  0x32   :  { %v87_v25 = vadd.s32 %v83_v23, %v71_v21  ;;  %v88_v26 = vadd.s32 %v84_v24, %v72_v22  ;;  %v99_v27 = vsel %vm95_vm7, 1, %v354_v16  ;;  %v100_v28 = vsel %vm96_vm8, 1, %v354_v16 }
  0x33   :  { %vm53_vm9 = vcmp.eq.s32.totalorder %v44_v14, %v50_v10  ;;  %vm54_vm10 = vcmp.eq.s32.totalorder %v45_v15, %v50_v10  ;;  %vm65_vm11 = vcmp.eq.s32.totalorder %v44_v14, %v62_v11  ;;  %vm66_vm12 = vcmp.eq.s32.totalorder %v45_v15, %v62_v11 }
  0x34   :  { %v103_v29 = vadd.s32 %v99_v27, %v87_v25  ;;  %v104_v30 = vadd.s32 %v100_v28, %v88_v26  ;;  %v57_v31 = vsel %vm53_vm9, 1, %v354_v16  ;;  %v58_v32 = vsel %vm54_vm10, 1, %v354_v16 }
  0x35   :  { %v69_v33 = vsel %vm65_vm11, 1, %v354_v16  ;;  %v70_v34 = vsel %vm66_vm12, 1, %v354_v16  ;;  %vm81_vm13 = vcmp.eq.s32.totalorder %v44_v14, %v78_v12  ;;  %vm82_vm14 = vcmp.eq.s32.totalorder %v45_v15, %v78_v12 }
  0x36   :  { %v107_v35 = vcvt.s32.f32 %v103_v29  ;;  %v108_v36 = vcvt.s32.f32 %v104_v30  ;;  %v73_v37 = vadd.s32 %v69_v33, %v57_v31  ;;  %v74_v38 = vadd.s32 %v70_v34, %v58_v32 }
  0x37   :  { %v85_v39 = vsel %vm81_vm13, 1, %v354_v16  ;;  %v86_v40 = vsel %vm82_vm14, 1, %v354_v16  ;;  %vm97_vm15 = vcmp.eq.s32.totalorder %v44_v14, %v94_v13  ;;  %vm98_vm1 = vcmp.eq.s32.totalorder %v45_v15, %v94_v13 }
  0x38   :  { %v257_v41 = vpack.c.bf16 %v108_v36, %v107_v35  ;;  %v89_v42 = vadd.s32 %v85_v39, %v73_v37  ;;  %v90_v43 = vadd.s32 %v86_v40, %v74_v38  ;;  %v101_v44 = vsel %vm97_vm15, 1, %v354_v16 }
  0x39   :  { %v102_v45 = vsel %vm98_vm1, 1, %v354_v16  ;;  %vm111_vm2 = vcmask 261120  }
  0x3a   :  { %258 = vmatpush3.bf16.msra.mxu0 %v257_v41  ;;  %264 = vmatpush3.bf16.msra.mxu1 %v257_v41  ;;  %v105_v46 = vadd.s32 %v101_v44, %v89_v42  ;;  %v106_v47 = vadd.s32 %v102_v45, %v90_v43 }
  0x3b   :  { %259 = vmatprep.subr.bf16.mxu0 %v351_v1  ;;  %263 = vmatprep.subr.bf16.mxu1 %v351_v1 }
  0x3c   :  { %v109_v48 = vcvt.s32.f32 %v105_v46  ;;  %v110_v49 = vcvt.s32.f32 %v106_v47 }
  0x3e   :  { %v260_v50 = vpack.c.bf16 %v110_v49, %v109_v48 }
  0x40   :  { %261 = vmatpush3.bf16.msra.mxu0 %v260_v50  ;;  %265 = vmatpush3.bf16.msra.mxu1 %v260_v50 }
  0x43   :  { %248 = vmatmul.mubr.msk.f32.vlgmr.msra.gmra.mrb[0].mxu0 %vm111_vm2, %v38_v51  ;;  %251 = vmatmul.mubr.msk.f32.vlgmr.msra.gmra.mrb[0].mxu1 %vm111_vm2, %v39_v52 }
  0x44   :  { %253 = vmatprep.mubr.msk.f32.mxu1 %vm352_vm0, %v353_v3 }
  0x47   :  { %254 = vmatmul.mubr.msk.f32.gmra.mrb[2].mxu1 %vm111_vm2, %v40_v53 }
 0x116   :  { %v187_v54 = vpop.f32.mrb[0].mxu0  ;;  %v192_v55 = vpop.f32.mrb[0].mxu1 }
 0x117   :  { %v201_v56 = vmul.f32 %v187_v54, %v187_v54  ;;  %v202_v57 = vmul.f32 %v192_v55, %v192_v55  ;;  %v249_v58 = vpop.f32.mrb[1].mxu0  ;;  %v252_v59 = vpop.f32.mrb[1].mxu1 }
 0x119   :  { %v203_v60 = vadd.f32 %v202_v57, %v201_v56 }
 0x11a   :  { %v197_v61 = vpop.f32.mrb[2].mxu1 }
 0x11b   :  { %v204_v62 = vrot.slane %v203_v60, 4  ;;  %v255_v63 = vpop.f32.mrb[3].mxu1 }
 0x11d   :  { %v205_v0 = vadd.f32 %v204_v62, %v203_v60 }
 0x11f   :  { %v206_v1 = vrot.slane %v205_v0, 2 }
 0x121   :  { %v207_v2 = vadd.f32 %v206_v1, %v205_v0 }
 0x123   :  { %v208_v4 = vrot.slane %v207_v2, 1 }
 0x125   :  { %v209_v5 = vadd.f32 %v208_v4, %v207_v2 }
 0x127   :  { %v210_v3 = vmul.f32 0.5, %v209_v5 }
 0x129   :  { %v211_v6 = vadd.f32 %v210_v3, %v197_v61 }
 0x12b   :  { %212 = vst [vmem:[#allocation7] sm:$0x1] %v211_v6 }
 0x12c   :  { %330 = shalt.err (!%p327_p6)
}
 0x12d   :  { %s331_s11 = scalar_lea.hbm %s426_s2, 16 }
 0x12e   :  { %p332_p7 = scmp.ne.s32.totalorder %s426_s2, %s331_s11  ;;  %p335_p8 = scmp.lt.u32.totalorder %s331_s11, %s426_s2 }
 0x130   :  { %p337_p9 = pnand %p335_p8, %p332_p7 }
 0x132   :  { %340 = shalt.err (!%p337_p9)
}
 0x133   :  { %222 = dma.vmem_to_hbm [thread:$0]  %s220_s6, 16, %s426_s2, [#allocation4]  }
 0x134   :  { %345 = dma.done.wait [#allocation4], 16  }
 0x135   :  { %346 = vsyncadd [#allocation4], 4294967280 }
 0x136   :  { %226 = vsyncpa [#allocation3], 1 }
 0x137   :  { %227 = vsyncpa [#allocation6], 1 }
 0x138   :  { %228 = vsyncpa [#allocation4], 1 }

</bundles_post_ra>
